<compile_context>
chip_gen: v5e
topology: v5e:2x2
jax: 0.10.0
libtpu: 0.0.40
codegen_flags: <defaults>
</compile_context>

<pallas_src>
import functools

import jax
import jax.numpy as jnp
import numpy as np
from jax.experimental import pallas as pl
from jax.experimental.pallas import tpu as pltpu


def _residual_block_kernel(
    x_ref,      # (C_in, B*L)        f32  activations, lane-dense batch slab
    w1s_ref,    # (2*C_out, 3*C_in)  bf16 [conv1 taps ; shortcut 1x1 in center slot]
    w2s_ref,    # (C_out, 3*C_out)   bf16 conv2 taps
    sew1_ref,   # (C_hid, C_out)     bf16 SE fc1
    sew2_ref,   # (C_out, C_hid)     bf16 SE fc2
    ab_ref,     # (2*C_out, 4)       f32  [[s1;ssc],[t1;tsc],[s2;0],[t2;0]]
    o_ref,      # (C_out, B*L)       f32
    *, L,
):
  C_out, BL = o_ref.shape
  B = BL // L
  f32, bf16 = jnp.float32, jnp.bfloat16

  x = x_ref[...]                                            # (C_in, BL) f32

  # --- per-segment boundary multiply-masks, built once, reused by both convs ---
  pos = jax.lax.broadcasted_iota(jnp.int32, (1, L), 1)
  lseg = (pos != 0).astype(f32)                             # zero where l-1 leaves segment
  rseg = (pos != L - 1).astype(f32)                         # zero where l+1 leaves segment
  lmask = jnp.concatenate([lseg] * B, axis=1)               # (1, BL)
  rmask = jnp.concatenate([rseg] * B, axis=1)               # (1, BL)

  def stack_taps(v):
    # (C, BL) -> (3*C, BL) = [v[l-1]; v[l]; v[l+1]] with zero-padding at segment edges.
    left = pltpu.roll(v, 1, axis=1) * lmask
    right = pltpu.roll(v, BL - 1, axis=1) * rmask
    return jnp.concatenate([left, v, right], axis=0).astype(bf16)

  # --- fused conv1 + 1x1 shortcut: one (2*C_out, 3*C_in) x (3*C_in, BL) matmul ---
  y = jnp.dot(w1s_ref[...], stack_taps(x), preferred_element_type=f32)
  y = y * ab_ref[:, 0:1] + ab_ref[:, 1:2]                   # folded bn1 / bn_shortcut
  h1 = jnp.maximum(y[:C_out], 0.0)                          # conv1 branch -> relu
  sc = y[C_out:]                                            # shortcut branch (no relu)
  # TODO(synk): Dropout(0.1) is identity in eval mode; training-mode RNG drop not implemented.

  # --- conv2 -> bn2 (folded): one (C_out, 3*C_out) x (3*C_out, BL) matmul ---
  h2 = jnp.dot(w2s_ref[...], stack_taps(h1), preferred_element_type=f32)
  h2 = h2 * ab_ref[:C_out, 2:3] + ab_ref[:C_out, 3:4]

  # --- SE: per-batch global average pool over L, batched 2-layer MLP, sigmoid gate ---
  pool = jnp.concatenate(
      [jnp.sum(h2[:, b * L:(b + 1) * L], axis=1, keepdims=True) for b in range(B)],
      axis=1) * (1.0 / L)                                   # (C_out, B) f32
  z = jnp.maximum(
      jnp.dot(sew1_ref[...], pool.astype(bf16), preferred_element_type=f32), 0.0)
  gate = jax.nn.sigmoid(
      jnp.dot(sew2_ref[...], z.astype(bf16), preferred_element_type=f32))  # (C_out, B)

  # --- gate * h2 + shortcut, final relu; one lane-dense (C_out, B*L) store ---
  gated = jnp.concatenate(
      [h2[:, b * L:(b + 1) * L] * gate[:, b:b + 1] for b in range(B)], axis=1)
  o_ref[...] = jnp.maximum(gated + sc, 0.0).astype(o_ref.dtype)


@jax.jit
def improved_residual_block(x, w1, s1, t1, w2, s2, t2, sew1, sew2, wsc, ssc, tsc):
  """x: (B, C_in, L) f32.  w1: (3, C_out, C_in) tap-major, w2: (3, C_out, C_out).
  s*/t*: folded BN scale/shift (C_out, 1).  wsc: (C_out, C_in) 1x1 shortcut conv."""
  B, C_in, L = x.shape
  C_out = w1.shape[1]
  BL = B * L
  bf16 = jnp.bfloat16

  # Lane-dense activation slab: batch segments side by side on the lane axis.
  x2d = jnp.transpose(x, (1, 0, 2)).reshape(C_in, BL)

  # Stacked conv1 weight with the 1x1 shortcut fused as extra output rows.
  w1_flat = jnp.concatenate([w1[0], w1[1], w1[2]], axis=1)               # (C_out, 3*C_in)
  wsc_flat = jnp.concatenate(
      [jnp.zeros_like(wsc), wsc, jnp.zeros_like(wsc)], axis=1)           # (C_out, 3*C_in)
  w1s = jnp.concatenate([w1_flat, wsc_flat], axis=0).astype(bf16)        # (2*C_out, 3*C_in)

  w2s = jnp.concatenate([w2[0], w2[1], w2[2]], axis=1).astype(bf16)      # (C_out, 3*C_out)

  # Consolidated folded-BN scale/shift table: columns = [s1;ssc], [t1;tsc], [s2;0], [t2;0].
  zc = jnp.zeros_like(s2)
  ab = jnp.concatenate([
      jnp.concatenate([s1, ssc], axis=0),
      jnp.concatenate([t1, tsc], axis=0),
      jnp.concatenate([s2, zc], axis=0),
      jnp.concatenate([t2, zc], axis=0),
  ], axis=1).astype(jnp.float32)                                         # (2*C_out, 4)

  out2d = pl.pallas_call(
      functools.partial(_residual_block_kernel, L=L),
      out_shape=jax.ShapeDtypeStruct((C_out, BL), jnp.float32),
  )(x2d, w1s, w2s, sew1.astype(bf16), sew2.astype(bf16), ab)

  return jnp.transpose(out2d.reshape(C_out, B, L), (1, 0, 2))            # (B, C_out, L)


def _fold_bn(gamma, beta, mean, var, conv_bias, eps=1e-5):
  scale = gamma / jnp.sqrt(var + eps)
  shift = scale * conv_bias + beta - scale * mean
  return scale[:, None].astype(jnp.float32), shift[:, None].astype(jnp.float32)


def _ref_forward(x, w1, s1, t1, w2, s2, t2, sew1, sew2, wsc, ssc, tsc):
  # Pure-JAX (f32) reference of the same eval-mode math.
  B, C_in, L = x.shape

  def conv3(v, w_t):  # v: (B,C,L) zero-padded conv, w_t: (3, Co, C)
    vp = jnp.pad(v, ((0, 0), (0, 0), (1, 1)))
    return sum(jnp.einsum('oc,bcl->bol', w_t[k], vp[:, :, k:k + L]) for k in range(3))

  h = jnp.maximum(conv3(x, w1) * s1[None] + t1[None], 0.0)
  h2 = conv3(h, w2) * s2[None] + t2[None]
  pool = jnp.mean(h2, axis=2)                              # (B, C_out)
  z = jnp.maximum(pool @ sew1.T, 0.0)
  gate = jax.nn.sigmoid(z @ sew2.T)[:, :, None]
  h2 = h2 * gate
  sc = jnp.einsum('oc,bcl->bol', wsc, x) * ssc[None] + tsc[None]
  return jnp.maximum(h2 + sc, 0.0)


if __name__ == "__main__":
  B, C_in, C_out, L, red = 2, 16, 32, 128, 16
  C_hid = C_out // red

  key = jax.random.PRNGKey(0)
  ks = jax.random.split(key, 20)
  f32 = jnp.float32

  x = jax.random.normal(ks[0], (B, C_in, L), f32)

  # conv1 + bn1 (PyTorch weight layout (C_out, C_in, 3) -> tap-major (3, C_out, C_in))
  w1_t = jnp.transpose(jax.random.normal(ks[1], (C_out, C_in, 3), f32) * 0.1, (2, 0, 1))
  b1 = jax.random.normal(ks[2], (C_out,), f32) * 0.1
  s1, t1 = _fold_bn(1.0 + 0.1 * jax.random.normal(ks[3], (C_out,), f32),
                    0.1 * jax.random.normal(ks[4], (C_out,), f32),
                    0.1 * jax.random.normal(ks[5], (C_out,), f32),
                    0.5 + jnp.abs(jax.random.normal(ks[6], (C_out,), f32)) * 0.5, b1)

  # conv2 + bn2
  w2_t = jnp.transpose(jax.random.normal(ks[7], (C_out, C_out, 3), f32) * 0.1, (2, 0, 1))
  b2 = jax.random.normal(ks[8], (C_out,), f32) * 0.1
  s2, t2 = _fold_bn(1.0 + 0.1 * jax.random.normal(ks[9], (C_out,), f32),
                    0.1 * jax.random.normal(ks[10], (C_out,), f32),
                    0.1 * jax.random.normal(ks[11], (C_out,), f32),
                    0.5 + jnp.abs(jax.random.normal(ks[12], (C_out,), f32)) * 0.5, b2)

  # SE block (bias-free linears)
  sew1 = jax.random.normal(ks[13], (C_hid, C_out), f32) * 0.2
  sew2 = jax.random.normal(ks[14], (C_out, C_hid), f32) * 0.2

  # shortcut 1x1 conv + bn (active because C_in != C_out)
  wsc = jax.random.normal(ks[15], (C_out, C_in), f32) * 0.1
  bsc = jax.random.normal(ks[16], (C_out,), f32) * 0.1
  ssc, tsc = _fold_bn(1.0 + 0.1 * jax.random.normal(ks[17], (C_out,), f32),
                      0.1 * jax.random.normal(ks[18], (C_out,), f32),
                      0.1 * jax.random.normal(ks[19], (C_out,), f32),
                      jnp.ones((C_out,), f32), bsc)

  params = (w1_t, s1, t1, w2_t, s2, t2, sew1, sew2, wsc, ssc, tsc)

  out = improved_residual_block(x, *params)
  out = jax.block_until_ready(out)

  ref = _ref_forward(x, *params)
  # Looser tolerance than pure-f32: MXU operands are bf16 (accumulation in f32).
  np.testing.assert_allclose(np.asarray(out), np.asarray(ref), rtol=2e-2, atol=3e-2)

  print("KERNEL_OK")
</pallas_src>

<mosaic_0001>
module attributes {stable_mosaic.version = 11 : i64} {
  func.func @_residual_block_kernel(%arg0: memref<16x256xf32, #tpu.memory_space<vmem>>, %arg1: memref<64x48xbf16, #tpu.memory_space<vmem>>, %arg2: memref<32x96xbf16, #tpu.memory_space<vmem>>, %arg3: memref<2x32xbf16, #tpu.memory_space<vmem>>, %arg4: memref<32x2xbf16, #tpu.memory_space<vmem>>, %arg5: memref<64x4xf32, #tpu.memory_space<vmem>>, %arg6: memref<32x256xf32, #tpu.memory_space<vmem>>) attributes {dimension_semantics = [], scalar_prefetch = 0 : i64, scratch_operands = 0 : i64, tpu.core_type = #tpu.core_type<tc>} {
    %c0 = arith.constant 0 : index
    %c0_0 = arith.constant 0 : index
    %0 = vector.load %arg0[%c0, %c0_0] : memref<16x256xf32, #tpu.memory_space<vmem>>, vector<16x256xf32>
    %1 = tpu.iota {dimensions = array<i32: 1>} : vector<1x128xi32>
    %c0_i32 = arith.constant 0 : i32
    %2 = vector.broadcast %c0_i32 : i32 to vector<1x128xi32>
    %3 = arith.cmpi ne, %1, %2 : vector<1x128xi32>
    %4 = arith.extui %3 : vector<1x128xi1> to vector<1x128xi32>
    %5 = arith.sitofp %4 : vector<1x128xi32> to vector<1x128xf32>
    %c127_i32 = arith.constant 127 : i32
    %6 = vector.broadcast %c127_i32 : i32 to vector<1x128xi32>
    %7 = arith.cmpi ne, %1, %6 : vector<1x128xi32>
    %8 = arith.extui %7 : vector<1x128xi1> to vector<1x128xi32>
    %9 = arith.sitofp %8 : vector<1x128xi32> to vector<1x128xf32>
    %10 = tpu.concatenate %5, %5 in 1 : vector<1x128xf32>, vector<1x128xf32> -> vector<1x256xf32>
    %11 = tpu.concatenate %9, %9 in 1 : vector<1x128xf32>, vector<1x128xf32> -> vector<1x256xf32>
    %c0_1 = arith.constant 0 : index
    %c0_2 = arith.constant 0 : index
    %12 = vector.load %arg1[%c0_1, %c0_2] : memref<64x48xbf16, #tpu.memory_space<vmem>>, vector<64x48xbf16>
    %c1_i32 = arith.constant 1 : i32
    %13 = tpu.dynamic_rotate %0 by %c1_i32 dim 1 : vector<16x256xf32>, i32 -> vector<16x256xf32>
    %14 = vector.broadcast %10 : vector<1x256xf32> to vector<16x256xf32>
    %15 = arith.mulf %13, %14 : vector<16x256xf32>
    %c255_i32 = arith.constant 255 : i32
    %16 = tpu.dynamic_rotate %0 by %c255_i32 dim 1 : vector<16x256xf32>, i32 -> vector<16x256xf32>
    %17 = vector.broadcast %11 : vector<1x256xf32> to vector<16x256xf32>
    %18 = arith.mulf %16, %17 : vector<16x256xf32>
    %19 = tpu.concatenate %15, %0, %18 in 0 : vector<16x256xf32>, vector<16x256xf32>, vector<16x256xf32> -> vector<48x256xf32>
    %20 = arith.truncf %19 : vector<48x256xf32> to vector<48x256xbf16>
    %cst = arith.constant dense<0.000000e+00> : vector<64x256xf32>
    %21 = tpu.matmul %12, %20, %cst {dimension_numbers = #tpu.dot_dimension_numbers<[1], [0], [0], [1], [0, 0, 1, 1], [], []>} : vector<64x48xbf16>, vector<48x256xbf16>, vector<64x256xf32> -> vector<64x256xf32>
    %c0_3 = arith.constant 0 : index
    %c0_4 = arith.constant 0 : index
    %22 = vector.load %arg5[%c0_3, %c0_4] : memref<64x4xf32, #tpu.memory_space<vmem>>, vector<64x1xf32>
    %23 = vector.broadcast %22 : vector<64x1xf32> to vector<64x256xf32>
    %24 = arith.mulf %21, %23 : vector<64x256xf32>
    %c0_5 = arith.constant 0 : index
    %c1 = arith.constant 1 : index
    %25 = vector.load %arg5[%c0_5, %c1] : memref<64x4xf32, #tpu.memory_space<vmem>>, vector<64x1xf32>
    %26 = vector.broadcast %25 : vector<64x1xf32> to vector<64x256xf32>
    %27 = arith.addf %24, %26 : vector<64x256xf32>
    %28 = vector.extract_strided_slice %27 {offsets = [0, 0], sizes = [32, 256], strides = [1, 1]} : vector<64x256xf32> to vector<32x256xf32>
    %cst_6 = arith.constant 0.000000e+00 : f32
    %29 = vector.broadcast %cst_6 : f32 to vector<32x256xf32>
    %30 = arith.maximumf %28, %29 : vector<32x256xf32>
    %31 = vector.extract_strided_slice %27 {offsets = [32, 0], sizes = [32, 256], strides = [1, 1]} : vector<64x256xf32> to vector<32x256xf32>
    %c0_7 = arith.constant 0 : index
    %c0_8 = arith.constant 0 : index
    %32 = vector.load %arg2[%c0_7, %c0_8] : memref<32x96xbf16, #tpu.memory_space<vmem>>, vector<32x96xbf16>
    %c1_i32_9 = arith.constant 1 : i32
    %33 = tpu.dynamic_rotate %30 by %c1_i32_9 dim 1 : vector<32x256xf32>, i32 -> vector<32x256xf32>
    %34 = vector.broadcast %10 : vector<1x256xf32> to vector<32x256xf32>
    %35 = arith.mulf %33, %34 : vector<32x256xf32>
    %c255_i32_10 = arith.constant 255 : i32
    %36 = tpu.dynamic_rotate %30 by %c255_i32_10 dim 1 : vector<32x256xf32>, i32 -> vector<32x256xf32>
    %37 = vector.broadcast %11 : vector<1x256xf32> to vector<32x256xf32>
    %38 = arith.mulf %36, %37 : vector<32x256xf32>
    %39 = tpu.concatenate %35, %30, %38 in 0 : vector<32x256xf32>, vector<32x256xf32>, vector<32x256xf32> -> vector<96x256xf32>
    %40 = arith.truncf %39 : vector<96x256xf32> to vector<96x256xbf16>
    %cst_11 = arith.constant dense<0.000000e+00> : vector<32x256xf32>
    %41 = tpu.matmul %32, %40, %cst_11 {dimension_numbers = #tpu.dot_dimension_numbers<[1], [0], [0], [1], [0, 0, 1, 1], [], []>} : vector<32x96xbf16>, vector<96x256xbf16>, vector<32x256xf32> -> vector<32x256xf32>
    %c0_12 = arith.constant 0 : index
    %c2 = arith.constant 2 : index
    %42 = vector.load %arg5[%c0_12, %c2] : memref<64x4xf32, #tpu.memory_space<vmem>>, vector<32x1xf32>
    %43 = vector.broadcast %42 : vector<32x1xf32> to vector<32x256xf32>
    %44 = arith.mulf %41, %43 : vector<32x256xf32>
    %c0_13 = arith.constant 0 : index
    %c3 = arith.constant 3 : index
    %45 = vector.load %arg5[%c0_13, %c3] : memref<64x4xf32, #tpu.memory_space<vmem>>, vector<32x1xf32>
    %46 = vector.broadcast %45 : vector<32x1xf32> to vector<32x256xf32>
    %47 = arith.addf %44, %46 : vector<32x256xf32>
    %48 = vector.extract_strided_slice %47 {offsets = [0, 0], sizes = [32, 128], strides = [1, 1]} : vector<32x256xf32> to vector<32x128xf32>
    %cst_14 = arith.constant dense<0.000000e+00> : vector<32xf32>
    %49 = vector.multi_reduction <add>, %48, %cst_14 [1] : vector<32x128xf32> to vector<32xf32>
    %50 = vector.shape_cast %49 : vector<32xf32> to vector<32x1xf32>
    %51 = vector.extract_strided_slice %47 {offsets = [0, 128], sizes = [32, 128], strides = [1, 1]} : vector<32x256xf32> to vector<32x128xf32>
    %cst_15 = arith.constant dense<0.000000e+00> : vector<32xf32>
    %52 = vector.multi_reduction <add>, %51, %cst_15 [1] : vector<32x128xf32> to vector<32xf32>
    %53 = vector.shape_cast %52 : vector<32xf32> to vector<32x1xf32>
    %54 = tpu.concatenate %50, %53 in 1 : vector<32x1xf32>, vector<32x1xf32> -> vector<32x2xf32>
    %cst_16 = arith.constant 7.812500e-03 : f32
    %55 = vector.broadcast %cst_16 : f32 to vector<32x2xf32>
    %56 = arith.mulf %54, %55 : vector<32x2xf32>
    %c0_17 = arith.constant 0 : index
    %c0_18 = arith.constant 0 : index
    %57 = vector.load %arg3[%c0_17, %c0_18] : memref<2x32xbf16, #tpu.memory_space<vmem>>, vector<2x32xbf16>
    %58 = arith.truncf %56 : vector<32x2xf32> to vector<32x2xbf16>
    %cst_19 = arith.constant dense<0.000000e+00> : vector<2x2xf32>
    %59 = tpu.matmul %57, %58, %cst_19 {dimension_numbers = #tpu.dot_dimension_numbers<[1], [0], [0], [1], [0, 0, 1, 1], [], []>} : vector<2x32xbf16>, vector<32x2xbf16>, vector<2x2xf32> -> vector<2x2xf32>
    %cst_20 = arith.constant 0.000000e+00 : f32
    %60 = vector.broadcast %cst_20 : f32 to vector<2x2xf32>
    %61 = arith.maximumf %59, %60 : vector<2x2xf32>
    %c0_21 = arith.constant 0 : index
    %c0_22 = arith.constant 0 : index
    %62 = vector.load %arg4[%c0_21, %c0_22] : memref<32x2xbf16, #tpu.memory_space<vmem>>, vector<32x2xbf16>
    %63 = arith.truncf %61 : vector<2x2xf32> to vector<2x2xbf16>
    %cst_23 = arith.constant dense<0.000000e+00> : vector<32x2xf32>
    %64 = tpu.matmul %62, %63, %cst_23 {dimension_numbers = #tpu.dot_dimension_numbers<[1], [0], [0], [1], [0, 0, 1, 1], [], []>} : vector<32x2xbf16>, vector<2x2xbf16>, vector<32x2xf32> -> vector<32x2xf32>
    %65 = arith.negf %64 : vector<32x2xf32>
    %66 = math.exp %65 : vector<32x2xf32>
    %cst_24 = arith.constant 1.000000e+00 : f32
    %67 = vector.broadcast %cst_24 : f32 to vector<32x2xf32>
    %68 = arith.addf %67, %66 : vector<32x2xf32>
    %69 = arith.divf %67, %68 : vector<32x2xf32>
    %70 = vector.extract_strided_slice %47 {offsets = [0, 0], sizes = [32, 128], strides = [1, 1]} : vector<32x256xf32> to vector<32x128xf32>
    %71 = vector.extract_strided_slice %69 {offsets = [0, 0], sizes = [32, 1], strides = [1, 1]} : vector<32x2xf32> to vector<32x1xf32>
    %72 = vector.broadcast %71 : vector<32x1xf32> to vector<32x128xf32>
    %73 = arith.mulf %70, %72 : vector<32x128xf32>
    %74 = vector.extract_strided_slice %47 {offsets = [0, 128], sizes = [32, 128], strides = [1, 1]} : vector<32x256xf32> to vector<32x128xf32>
    %75 = vector.extract_strided_slice %69 {offsets = [0, 1], sizes = [32, 1], strides = [1, 1]} : vector<32x2xf32> to vector<32x1xf32>
    %76 = vector.broadcast %75 : vector<32x1xf32> to vector<32x128xf32>
    %77 = arith.mulf %74, %76 : vector<32x128xf32>
    %78 = tpu.concatenate %73, %77 in 1 : vector<32x128xf32>, vector<32x128xf32> -> vector<32x256xf32>
    %79 = arith.addf %78, %31 : vector<32x256xf32>
    %cst_25 = arith.constant 0.000000e+00 : f32
    %80 = vector.broadcast %cst_25 : f32 to vector<32x256xf32>
    %81 = arith.maximumf %79, %80 : vector<32x256xf32>
    %c0_26 = arith.constant 0 : index
    %c0_27 = arith.constant 0 : index
    %82 = vector.load %arg6[%c0_26, %c0_27] : memref<32x256xf32, #tpu.memory_space<vmem>>, vector<32x256xf32>
    tpu.vector_store %arg6[%c0_26, %c0_27], %81 {strides = array<i32>} : memref<32x256xf32, #tpu.memory_space<vmem>>, vector<32x256xf32>,
    return
  }
}

</mosaic_0001>

<bundles_post_ra>
// kernel: improved_residual_block.1
= control target key start
LH: loop header
LB: loop body
LE: loop exit
PB: predicated region body
PF: predicated region fallthrough
CT: control target
= control target key end

     0   :  { %s835_s25 = smov 127   ;;  %s836_s26 = smov 1   ;;  %v28_v4 = vlaneseq  ;;  %v837_v7 = vmov 1   ;;  %v838_v8 = vmov 0   ;;  %v839_v13 = vmov 0.0   ;;  %s1224_s0 = inlined_call_operand.vmem [shape: f32[16,256], index: 0, kind: input, shape index: {}]   ;;  %s1225_s5 = inlined_call_operand.vmem [shape: f32[64,4], index: 5, kind: input, shape index: {}]   ;;  %s1226_s1 = inlined_call_operand.vmem [shape: bf16[64,48], index: 1, kind: input, shape index: {}]   ;;  %s1227_s2 = inlined_call_operand.vmem [shape: bf16[32,96], index: 2, kind: input, shape index: {}]   ;;  %s1228_s3 = inlined_call_operand.vmem [shape: bf16[2,32], index: 3, kind: input, shape index: {}]   ;;  %s1229_s4 = inlined_call_operand.vmem [shape: bf16[32,2], index: 4, kind: input, shape index: {}]   ;;  %s1230_s6 = inlined_call_operand.vmem [shape: f32[32,256], index: 6, kind: output, shape index: {}]  }
   0x1   :  { %v880_v0 = vld [vmem:[%s1224_s0 + $0x8] sm:$0xff]  ;;  %v885_v1 = vld [vmem:[%s1224_s0] sm:$0xff]  ;;  %v896_v2 = vld [vmem:[%s1224_s0 + $0x18] sm:$0xff]  ;;  %797 = vset.pattern.permute.xlu1 %v837_v7  ;;  %796 = vset.pattern.permute.xlu0 %v838_v8  ;;  %vm106_vm4 = vcmask 392192   ;;  %vm387_vm5 = vcmask 785408   ;;  %vm504_vm6 = vcmask 7168  }
   0x2   :  { %66 = vrot.lane.b32.xlu1 %v880_v0, %s835_s25  ;;  %62 = vrot.lane.b32.xlu0 %v885_v1, %s835_s25  ;;  %v901_v3 = vld [vmem:[%s1224_s0 + $0x10] sm:$0xff]  ;;  %v921_v6 = vld [vmem:[%s1225_s5 + $0x18] sm:$0xff]  ;;  %v925_v9 = vand.u32 127, %v28_v4  ;;  %v83_v34 = vpack.c.bf16 %v896_v2, %v880_v0  ;;  %vm516_vm7 = vcmask 261120   ;;  %vm556_vm8 = vcmask 1040384  }
   0x3   :  { %44 = vrot.lane.b32.xlu2 %v885_v1, %s836_s26  ;;  %v916_v5 = vld [vmem:[%s1225_s5 + $0x10] sm:$0xff]  ;;  %v935_v12 = vld [vmem:[%s1225_s5] sm:$0xff]  ;;  %v962_v30 = vld [vmem:[%s1225_s5 + $0x8] sm:$0xff]  ;;  %v82_v33 = vpack.c.bf16 %v901_v3, %v885_v1  ;;  %vm549_vm9 = vcmask 15360  }
   0x4   :  { %795 = vset.pattern.permute.xlu2 %v838_v8  ;;  %vm33_vm0 = vcmp.ne.s32.totalorder %v925_v9, 127  ;;  %vm70_vm1 = vcmp.lt.s32.totalorder %v925_v9, 127  ;;  %vm30_vm2 = vcmp.ne.s32.totalorder %v925_v9, 0  ;;  %vm52_vm3 = vcmp.lt.s32.totalorder %v925_v9, 1  ;;  %v780_v47 = vld [vmem:[%s1226_s1] sm:$0xff]  ;;  %v781_v48 = vld [vmem:[%s1226_s1 + $0x8] sm:$0xff] }
   0x5   :  { %v728_v14 = vsel %vm33_vm0, 1.0, %v839_v13  ;;  %v727_v27 = vsel %vm30_vm2, 1.0, %v839_v13  ;;  %v785_v9 = vld [vmem:[%s1227_s2 + $0x8] sm:$0xff] }
   0x6   :  { %v942_v16 = vperm.slane %v728_v14, 0  ;;  %v965_v31 = vperm.slane %v727_v27, 0 }
   0xa   :  { %68 = vrot.lane.b32.xlu1 %v896_v2, %s835_s25  ;;  %64 = vrot.lane.b32.xlu0 %v901_v3, %s835_s25 }
   0xb   :  { %46 = vrot.lane.b32.xlu2 %v901_v3, %s836_s26 }
  0x12   :  { %50 = vrot.lane.b32.xlu1 %v896_v2, %s836_s26  ;;  %48 = vrot.lane.b32.xlu0 %v880_v0, %s836_s26 }
  0x13   :  { %197 = vperm.xlu2 %795, %v916_v5  }
  0x1a   :  { %250 = vperm.xlu1 %797, %v916_v5   ;;  %202 = vperm.xlu0 %796, %v921_v6  }
  0x1b   :  { %798 = vset.pattern.permute.xlu2 %v837_v7 }
  0x1c   :  { %254 = vperm.xlu2 %798, %v921_v6  }
  0x22   :  { %799 = vset.pattern.permute.xlu1 %v838_v8  ;;  %801 = vset.pattern.permute.xlu0 %v837_v7 }
  0x23   :  { %187 = vperm.xlu1 %799, %v935_v12   ;;  %242 = vperm.xlu0 %801, %v935_v12  }
  0x24   :  { %800 = vset.pattern.permute.xlu2 %v838_v8 }
  0x25   :  { %192 = vperm.xlu2 %800, %v962_v30  }
  0x2b   :  { %802 = vset.pattern.permute.xlu1 %v837_v7 }
  0x2c   :  { %246 = vperm.xlu1 %802, %v962_v30  }
  0x5d   :  { %v45_v15 = vpop.permute.xlu2 %44 }
  0x65   :  { %v47_v32 = vpop.permute.xlu2 %46 }
  0x6d   :  { %v198_v49 = vpop.permute.xlu2 %197 }
  0x74   :  { %v67_v10 = vpop.permute.xlu1 %66  ;;  %v63_v11 = vpop.permute.xlu0 %62 }
  0x75   :  { %v71_v17 = vsel %vm70_vm1, %v63_v11, %v67_v10  ;;  %v73_v18 = vsel %vm70_vm1, %v67_v10, %v63_v11 }
  0x76   :  { %v76_v23 = vmul.f32 %v942_v16, %v71_v17  ;;  %v77_v25 = vmul.f32 %v942_v16, %v73_v18  ;;  %v255_v52 = vpop.permute.xlu2 %254 }
  0x7c   :  { %v69_v19 = vpop.permute.xlu1 %68  ;;  %v65_v20 = vpop.permute.xlu0 %64 }
  0x7d   :  { %v72_v21 = vsel %vm70_vm1, %v65_v20, %v69_v19  ;;  %v74_v22 = vsel %vm70_vm1, %v69_v19, %v65_v20 }
  0x7e   :  { %v78_v24 = vmul.f32 %v942_v16, %v72_v21  ;;  %v79_v26 = vmul.f32 %v942_v16, %v74_v22 }
  0x7f   :  { %v193_v63 = vpop.permute.xlu2 %192 }
  0x80   :  { %v84_v28 = vpack.c.bf16 %v78_v24, %v76_v23  ;;  %v85_v29 = vpack.c.bf16 %v79_v26, %v77_v25 }
  0x82   :  { %124 = vmatpush.bf16.msra.mxu0 %v84_v28  ;;  %153 = vmatpush.bf16.msra.mxu1 %v85_v29 }
  0x84   :  { %v51_v35 = vpop.permute.xlu1 %50  ;;  %v49_v36 = vpop.permute.xlu0 %48 }
  0x85   :  { %v54_v37 = vsel %vm52_vm3, %v47_v32, %v51_v35  ;;  %v56_v38 = vsel %vm52_vm3, %v51_v35, %v47_v32  ;;  %v53_v39 = vsel %vm52_vm3, %v45_v15, %v49_v36  ;;  %v55_v40 = vsel %vm52_vm3, %v49_v36, %v45_v15 }
  0x86   :  { %v60_v41 = vmul.f32 %v965_v31, %v56_v38  ;;  %v61_v42 = vmul.f32 %v965_v31, %v54_v37  ;;  %v58_v43 = vmul.f32 %v965_v31, %v55_v40  ;;  %v59_v44 = vmul.f32 %v965_v31, %v53_v39  ;;  %125 = vmatpush.bf16.msra.mxu0 %v82_v33 }
  0x87   :  { %154 = vmatpush.bf16.msra.mxu1 %v83_v34 }
  0x88   :  { %v80_v45 = vpack.c.bf16 %v60_v41, %v58_v43  ;;  %v81_v46 = vpack.c.bf16 %v61_v42, %v59_v44 }
  0x8a   :  { %126 = vmatpush.bf16.msra.mxu0 %v80_v45 }
  0x8b   :  { %155 = vmatpush.bf16.msra.mxu1 %v81_v46 }
  0x8c   :  { %v251_v50 = vpop.permute.xlu1 %250  ;;  %v203_v51 = vpop.permute.xlu0 %202 }
  0x8d   :  { %745 = vmatmul.msk.bf16.vlgmr.msra.gmra.mxu0 %vm106_vm4, %v780_v47 }
  0x8e   :  { %749 = vmatmul.msk.bf16.vlgmr.msra.gmra.mxu1 %vm106_vm4, %v780_v47 }
  0x95   :  { %v188_v53 = vpop.permute.xlu1 %187  ;;  %v243_v55 = vpop.permute.xlu0 %242 }
  0x9d   :  { %746 = vmatmul.msk.bf16.gmra.mxu0 %vm106_vm4, %v781_v48 }
  0x9e   :  { %750 = vmatmul.msk.bf16.gmra.mxu1 %vm106_vm4, %v781_v48  ;;  %v247_v1 = vpop.permute.xlu1 %246 }
 0x10a   :  { %v128_v54 = vpop.f32.mrf.mxu0 }
 0x10b   :  { %v225_v56 = vmul.f32 %v188_v53, %v128_v54  ;;  %v157_v57 = vpop.f32.mrf.mxu1  ;;  %v840_v54 = vmov 2  }
 0x10c   :  { %v226_v58 = vmul.f32 %v188_v53, %v157_v57  ;;  %803 = vset.pattern.permute.xlu1 %v840_v54  ;;  %804 = vset.pattern.permute.xlu2 %v840_v54 }
 0x10d   :  { %v273_v59 = vadd.f32 %v243_v55, %v225_v56 }
 0x10e   :  { %v274_v60 = vadd.f32 %v243_v55, %v226_v58  ;;  %v841_v55 = vmov 3  }
 0x10f   :  { %v997_v61 = vmax.f32 %v273_v59, 0.0  ;;  %805 = vset.pattern.permute.xlu0 %v841_v55 }
 0x110   :  { %v999_v62 = vmax.f32 %v274_v60, 0.0 }
 0x111   :  { %333 = vrot.lane.b32.xlu1 %v997_v61, %s835_s25 }
 0x112   :  { %341 = vrot.lane.b32.xlu0 %v999_v62, %s835_s25  ;;  %v130_v0 = vpop.f32.mrf.mxu0 }
 0x113   :  { %v227_v2 = vmul.f32 %v193_v63, %v130_v0  ;;  %v159_v3 = vpop.f32.mrf.mxu1 }
 0x114   :  { %v228_v4 = vmul.f32 %v193_v63, %v159_v3 }
 0x115   :  { %v275_v10 = vadd.f32 %v247_v1, %v227_v2 }
 0x116   :  { %v276_v11 = vadd.f32 %v247_v1, %v228_v4 }
 0x117   :  { %v1005_v13 = vmax.f32 %v275_v10, 0.0 }
 0x118   :  { %v1007_v14 = vmax.f32 %v276_v11, 0.0 }
 0x119   :  { %335 = vrot.lane.b32.xlu2 %v1005_v13, %s835_s25  ;;  %v369_v15 = vpack.c.bf16 %v1005_v13, %v997_v61 }
 0x11a   :  { %v133_v17 = vpop.f32.mrf.mxu0  ;;  %v370_v18 = vpack.c.bf16 %v1007_v14, %v999_v62 }
 0x11b   :  { %v229_v19 = vmul.f32 %v198_v49, %v133_v17  ;;  %v162_v20 = vpop.f32.mrf.mxu1 }
 0x11c   :  { %v230_v23 = vmul.f32 %v198_v49, %v162_v20 }
 0x11d   :  { %v277_v21 = vadd.f32 %v251_v50, %v229_v19 }
 0x11e   :  { %v278_v25 = vadd.f32 %v251_v50, %v230_v23 }
 0x11f   :  { %v1015_v22 = vmax.f32 %v277_v21, 0.0 }
 0x120   :  { %v1019_v33 = vmax.f32 %v278_v25, 0.0 }
 0x121   :  { %337 = vrot.lane.b32.xlu2 %v1015_v22, %s835_s25 }
 0x122   :  { %v135_v24 = vpop.f32.mrf.mxu0 }
 0x123   :  { %v231_v26 = vmul.f32 %v203_v51, %v135_v24  ;;  %v164_v27 = vpop.f32.mrf.mxu1 }
 0x124   :  { %v232_v28 = vmul.f32 %v203_v51, %v164_v27 }
 0x125   :  { %v279_v29 = vadd.f32 %v255_v52, %v231_v26 }
 0x126   :  { %v280_v32 = vadd.f32 %v255_v52, %v232_v28 }
 0x127   :  { %v1021_v34 = vmax.f32 %v279_v29, 0.0 }
 0x128   :  { %v1023_v35 = vmax.f32 %v280_v32, 0.0 }
 0x129   :  { %345 = vrot.lane.b32.xlu2 %v1019_v33, %s835_s25  ;;  %339 = vrot.lane.b32.xlu1 %v1021_v34, %s835_s25  ;;  %v371_v36 = vpack.c.bf16 %v1021_v34, %v1015_v22 }
 0x12a   :  { %347 = vrot.lane.b32.xlu0 %v1023_v35, %s835_s25  ;;  %v372_v37 = vpack.c.bf16 %v1023_v35, %v1019_v33 }
 0x131   :  { %305 = vrot.lane.b32.xlu2 %v1015_v22, %s836_s26  ;;  %343 = vrot.lane.b32.xlu1 %v1007_v14, %s835_s25 }
 0x132   :  { %301 = vrot.lane.b32.xlu0 %v997_v61, %s836_s26 }
 0x139   :  { %315 = vrot.lane.b32.xlu2 %v1023_v35, %s836_s26  ;;  %313 = vrot.lane.b32.xlu1 %v1019_v33, %s836_s26 }
 0x13a   :  { %307 = vrot.lane.b32.xlu0 %v1021_v34, %s836_s26 }
 0x141   :  { %309 = vrot.lane.b32.xlu2 %v999_v62, %s836_s26  ;;  %303 = vrot.lane.b32.xlu1 %v1005_v13, %s836_s26 }
 0x142   :  { %311 = vrot.lane.b32.xlu0 %v1007_v14, %s836_s26 }
 0x149   :  { %448 = vperm.xlu1 %803, %v916_v5   ;;  %453 = vperm.xlu2 %804, %v921_v6  }
 0x14a   :  { %473 = vperm.xlu0 %805, %v916_v5  }
 0x151   :  { %806 = vset.pattern.permute.xlu1 %v841_v55  ;;  %438 = vperm.xlu2 %804, %v935_v12  }
 0x152   :  { %469 = vperm.xlu0 %805, %v962_v30   ;;  %477 = vperm.xlu1 %806, %v921_v6  }
 0x159   :  { %808 = vset.pattern.permute.xlu2 %v841_v55 }
 0x15a   :  { %810 = vset.pattern.permute.xlu0 %v838_v8  ;;  %807 = vset.pattern.permute.xlu1 %v840_v54 }
 0x15b   :  { %443 = vperm.xlu1 %807, %v962_v30   ;;  %465 = vperm.xlu2 %808, %v935_v12  }
 0x163   :  { %811 = vset.pattern.permute.xlu1 %v838_v8  ;;  %809 = vset.pattern.permute.xlu2 %v838_v8 }
 0x173   :  { %v336_v38 = vpop.permute.xlu2 %335 }
 0x17b   :  { %v338_v39 = vpop.permute.xlu2 %337 }
 0x183   :  { %v334_v40 = vpop.permute.xlu1 %333  ;;  %v346_v42 = vpop.permute.xlu2 %345 }
 0x184   :  { %v342_v41 = vpop.permute.xlu0 %341  ;;  %v351_v43 = vsel %vm70_vm1, %v338_v39, %v346_v42  ;;  %v355_v44 = vsel %vm70_vm1, %v346_v42, %v338_v39 }
 0x185   :  { %v361_v47 = vmul.f32 %v351_v43, %v942_v16  ;;  %v362_v52 = vmul.f32 %v355_v44, %v942_v16  ;;  %v349_v58 = vsel %vm70_vm1, %v334_v40, %v342_v41  ;;  %v353_v59 = vsel %vm70_vm1, %v342_v41, %v334_v40 }
 0x186   :  { %v357_v1 = vmul.f32 %v349_v58, %v942_v16  ;;  %v358_v2 = vmul.f32 %v353_v59, %v942_v16 }
 0x18b   :  { %v306_v50 = vpop.permute.xlu2 %305 }
 0x193   :  { %v316_v17 = vpop.permute.xlu2 %315 }
 0x19b   :  { %v340_v45 = vpop.permute.xlu1 %339  ;;  %v310_v22 = vpop.permute.xlu2 %309 }
 0x19c   :  { %v348_v46 = vpop.permute.xlu0 %347 }
 0x19d   :  { %v352_v48 = vsel %vm70_vm1, %v340_v45, %v348_v46  ;;  %v356_v49 = vsel %vm70_vm1, %v348_v46, %v340_v45 }
 0x19e   :  { %v363_v51 = vmul.f32 %v352_v48, %v942_v16  ;;  %v364_v53 = vmul.f32 %v356_v49, %v942_v16 }
 0x1a0   :  { %v375_v56 = vpack.c.bf16 %v363_v51, %v361_v47  ;;  %v376_v57 = vpack.c.bf16 %v364_v53, %v362_v52 }
 0x1a2   :  { %396 = vmatpush.bf16.msra.mxu2 %v375_v56  ;;  %415 = vmatpush.bf16.msra.mxu3 %v376_v57 }
 0x1a3   :  { %v344_v60 = vpop.permute.xlu1 %343 }
 0x1a4   :  { %v302_v63 = vpop.permute.xlu0 %301  ;;  %v350_v0 = vsel %vm70_vm1, %v336_v38, %v344_v60  ;;  %v354_v5 = vsel %vm70_vm1, %v344_v60, %v336_v38 }
 0x1a5   :  { %v359_v3 = vmul.f32 %v350_v0, %v942_v16  ;;  %v360_v4 = vmul.f32 %v354_v5, %v942_v16  ;;  %v317_v28 = vsel %vm52_vm3, %v302_v63, %v310_v22  ;;  %v321_v29 = vsel %vm52_vm3, %v310_v22, %v302_v63 }
 0x1a6   :  { %v325_v14 = vmul.f32 %v321_v29, %v965_v31 }
 0x1a7   :  { %v373_v10 = vpack.c.bf16 %v359_v3, %v357_v1  ;;  %v374_v11 = vpack.c.bf16 %v360_v4, %v358_v2 }
 0x1a9   :  { %397 = vmatpush.bf16.msra.mxu2 %v373_v10  ;;  %416 = vmatpush.bf16.msra.mxu3 %v374_v11 }
 0x1ab   :  { %v314_v19 = vpop.permute.xlu1 %313 }
 0x1ac   :  { %v308_v20 = vpop.permute.xlu0 %307  ;;  %v323_v21 = vsel %vm52_vm3, %v314_v19, %v306_v50  ;;  %v319_v24 = vsel %vm52_vm3, %v306_v50, %v314_v19 }
 0x1ad   :  { %v320_v16 = vsel %vm52_vm3, %v308_v20, %v316_v17  ;;  %v324_v23 = vsel %vm52_vm3, %v316_v17, %v308_v20  ;;  %398 = vmatpush.bf16.msra.mxu2 %v371_v36  ;;  %417 = vmatpush.bf16.msra.mxu3 %v372_v37  ;;  %v329_v25 = vmul.f32 %v323_v21, %v965_v31  ;;  %v784_v36 = vld [vmem:[%s1227_s2] sm:$0xff] }
 0x1ae   :  { %v331_v6 = vmul.f32 %v324_v23, %v965_v31  ;;  %v332_v26 = vmul.f32 %v320_v16, %v965_v31  ;;  %v330_v27 = vmul.f32 %v319_v24, %v965_v31 }
 0x1b0   :  { %v367_v33 = vpack.c.bf16 %v331_v6, %v329_v25  ;;  %v368_v13 = vpack.c.bf16 %v332_v26, %v330_v27 }
 0x1b1   :  { %399 = vmatpush.bf16.msra.mxu2 %v369_v15  ;;  %418 = vmatpush.bf16.msra.mxu3 %v370_v18  ;;  %v326_v15 = vmul.f32 %v317_v28, %v965_v31 }
 0x1b3   :  { %v304_v32 = vpop.permute.xlu1 %303 }
 0x1b4   :  { %v312_v61 = vpop.permute.xlu0 %311 }
 0x1b5   :  { %v318_v30 = vsel %vm52_vm3, %v304_v32, %v312_v61  ;;  %v322_v62 = vsel %vm52_vm3, %v312_v61, %v304_v32  ;;  %400 = vmatpush.bf16.msra.mxu2 %v367_v33  ;;  %419 = vmatpush.bf16.msra.mxu3 %v368_v13  ;;  %v513_v61 = vld [vmem:[%s1228_s3] sm:$0x1]  ;;  %v782_v13 = vld [vmem:[%s1226_s1 + $0x10] sm:$0xff] }
 0x1b6   :  { %v327_v18 = vmul.f32 %v322_v62, %v965_v31  ;;  %v328_v34 = vmul.f32 %v318_v30, %v965_v31  ;;  %v454_v31 = vpop.permute.xlu2 %453  ;;  %747 = vmatmul.msk.bf16.gmra.mxu0 %vm106_vm4, %v782_v13  ;;  %751 = vmatmul.msk.bf16.gmra.mxu1 %vm106_vm4, %v782_v13 }
 0x1b8   :  { %v365_v35 = vpack.c.bf16 %v327_v18, %v325_v14  ;;  %v366_v12 = vpack.c.bf16 %v328_v34, %v326_v15  ;;  %v786_v18 = vld [vmem:[%s1229_s4] sm:$0xff] }
 0x1ba   :  { %401 = vmatpush.bf16.msra.mxu2 %v365_v35  ;;  %420 = vmatpush.bf16.msra.mxu3 %v366_v12  ;;  %v787_v35 = vld [vmem:[%s1229_s4 + $0x8] sm:$0xff]  ;;  %v783_v12 = vld [vmem:[%s1226_s1 + $0x18] sm:$0xff] }
 0x1bb   :  { %v449_v38 = vpop.permute.xlu1 %448 }
 0x1bc   :  { %v474_v47 = vpop.permute.xlu0 %473 }
 0x1bd   :  { %761 = vmatmul.msk.bf16.vlgmr.msra.gmra.mxu2 %vm387_vm5, %v784_v36  ;;  %763 = vmatmul.msk.bf16.vlgmr.msra.gmra.mxu3 %vm387_vm5, %v784_v36  ;;  %v183_v36 = vld [vmem:[%s1225_s5 + $0x30] sm:$0xff] }
 0x1be   :  { %v439_v37 = vpop.permute.xlu2 %438 }
 0x1c4   :  { %v478_v46 = vpop.permute.xlu1 %477  ;;  %v470_v57 = vpop.permute.xlu0 %469 }
 0x1c6   :  { %v466_v39 = vpop.permute.xlu2 %465  ;;  %748 = vmatmul.msk.bf16.gmra.mxu0 %vm106_vm4, %v783_v12  ;;  %752 = vmatmul.msk.bf16.gmra.mxu1 %vm106_vm4, %v783_v12 }
 0x1cd   :  { %762 = vmatmul.msk.bf16.gmra.mxu2 %vm387_vm5, %v785_v9  ;;  %764 = vmatmul.msk.bf16.gmra.mxu3 %vm387_vm5, %v785_v9  ;;  %v444_v54 = vpop.permute.xlu1 %443  ;;  %v181_v9 = vld [vmem:[%s1225_s5 + $0x20] sm:$0xff] }
 0x240   :  { %v422_v40 = vpop.f32.mrf.mxu3  ;;  %v403_v41 = vpop.f32.mrf.mxu2 }
 0x241   :  { %v456_v42 = vmul.f32 %v439_v37, %v403_v41  ;;  %v457_v55 = vmul.f32 %v439_v37, %v422_v40  ;;  %v182_v37 = vld [vmem:[%s1225_s5 + $0x28] sm:$0xff] }
 0x243   :  { %v1130_v43 = vadd.f32 %v466_v39, %v456_v42  ;;  %v1139_v60 = vadd.f32 %v466_v39, %v457_v55 }
 0x245   :  { %488 = vadd.xlane.f32.xlu1 %v1130_v43 }
 0x248   :  { %v424_v44 = vpop.f32.mrf.mxu3  ;;  %v405_v45 = vpop.f32.mrf.mxu2 }
 0x249   :  { %v459_v56 = vmul.f32 %v444_v54, %v424_v44  ;;  %v458_v3 = vmul.f32 %v444_v54, %v405_v45 }
 0x24b   :  { %v1141_v63 = vadd.f32 %v470_v57, %v459_v56  ;;  %v1151_v4 = vadd.f32 %v470_v57, %v458_v3 }
 0x250   :  { %v408_v48 = vpop.f32.mrf.mxu2  ;;  %v427_v49 = vpop.f32.mrf.mxu3 }
 0x251   :  { %v460_v50 = vmul.f32 %v449_v38, %v408_v48  ;;  %v461_v51 = vmul.f32 %v449_v38, %v427_v49 }
 0x253   :  { %v1133_v52 = vadd.f32 %v474_v47, %v461_v51  ;;  %v1135_v53 = vadd.f32 %v474_v47, %v460_v50 }
 0x255   :  { %500 = vadd.xlane.f32.xlu0 %v1133_v52  ;;  %492 = vadd.xlane.f32.xlu1 %v1135_v53 }
 0x258   :  { %v410_v58 = vpop.f32.mrf.mxu2  ;;  %v429_v5 = vpop.f32.mrf.mxu3 }
 0x259   :  { %v462_v59 = vmul.f32 %v454_v31, %v410_v58  ;;  %v463_v1 = vmul.f32 %v454_v31, %v429_v5  ;;  %v184_v31 = vld [vmem:[%s1225_s5 + $0x38] sm:$0xff] }
 0x25b   :  { %v1143_v0 = vadd.f32 %v478_v46, %v462_v59  ;;  %v1148_v2 = vadd.f32 %v478_v46, %v463_v1 }
 0x25d   :  { %496 = vadd.xlane.f32.xlu0 %v1139_v60  ;;  %498 = vadd.xlane.f32.xlu1 %v1141_v63 }
 0x25e   :  { %494 = vadd.xlane.f32.xlu2 %v1143_v0 }
 0x266   :  { %502 = vadd.xlane.f32.xlu2 %v1148_v2 }
 0x26e   :  { %490 = vadd.xlane.f32.xlu2 %v1151_v4 }
 0x271   :  { %212 = vperm.xlu0 %810, %v182_v37  }
 0x276   :  { %217 = vperm.xlu1 %811, %v183_v36  }
 0x27e   :  { %812 = vset.pattern.permute.xlu1 %v837_v7 }
 0x27f   :  { %258 = vperm.xlu1 %812, %v181_v9  }
 0x286   :  { %207 = vperm.xlu2 %809, %v181_v9  }
 0x287   :  { %266 = vperm.xlu1 %812, %v183_v36  }
 0x28e   :  { %222 = vperm.xlu2 %809, %v184_v31  }
 0x296   :  { %813 = vset.pattern.permute.xlu2 %v837_v7 }
 0x297   :  { %262 = vperm.xlu2 %813, %v182_v37  }
 0x29f   :  { %270 = vperm.xlu2 %813, %v184_v31  }
 0x2a7   :  { %815 = vset.pattern.permute.xlu2 %v838_v8 }
 0x2b8   :  { %v489_v10 = vpop.xlane.xlu1 %488 }
 0x2c8   :  { %v501_v17 = vpop.xlane.xlu0 %500  ;;  %v493_v19 = vpop.xlane.xlu1 %492 }
 0x2c9   :  { %v507_v20 = vsel %vm504_vm6, %v493_v19, %v501_v17 }
 0x2ca   :  { %v511_v23 = vmul.f32 0.0078125, %v507_v20 }
 0x2d0   :  { %v497_v6 = vpop.xlane.xlu0 %496  ;;  %v499_v27 = vpop.xlane.xlu1 %498 }
 0x2d1   :  { %v495_v11 = vpop.xlane.xlu2 %494  ;;  %v505_v26 = vsel %vm504_vm6, %v489_v10, %v497_v6 }
 0x2d2   :  { %v509_v29 = vmul.f32 0.0078125, %v505_v26 }
 0x2d9   :  { %v503_v21 = vpop.xlane.xlu2 %502 }
 0x2da   :  { %v508_v16 = vsel %vm504_vm6, %v495_v11, %v503_v21 }
 0x2db   :  { %v512_v24 = vmul.f32 0.0078125, %v508_v16 }
 0x2dd   :  { %v515_v25 = vpack.c.bf16 %v512_v24, %v511_v23 }
 0x2df   :  { %526 = vmatpush.bf16.msrb.mxu2 %v515_v25 }
 0x2e1   :  { %v491_v22 = vpop.xlane.xlu2 %490 }
 0x2e2   :  { %v506_v28 = vsel %vm504_vm6, %v491_v22, %v499_v27 }
 0x2e3   :  { %v510_v32 = vmul.f32 0.0078125, %v506_v28 }
 0x2e5   :  { %v514_v33 = vpack.c.bf16 %v510_v32, %v509_v29 }
 0x2e7   :  { %527 = vmatpush.bf16.msrb.mxu2 %v514_v33 }
 0x2ea   :  { %765 = vmatmul.msk.bf16.vlgmr.msrb.gmra.mxu2 %vm516_vm7, %v513_v61 }
 0x36d   :  { %v529_v30 = vpop.f32.mrf.mxu2 }
 0x36e   :  { %v533_v62 = vmax.f32 %v529_v30, 0.0 }
 0x370   :  { %v538_v14 = vpack.c.bf16 %v533_v62, %v533_v62 }
 0x372   :  { %v558_v15 = vsel %vm556_vm8, %v538_v14, 0 }
 0x373   :  { %567 = vmatpush.bf16.msrb.mxu3 %v558_v15 }
 0x375   :  { %v531_v34 = vpop.f32.mrf.mxu2 }
 0x376   :  { %774 = vmatmul.msk.bf16.vlgmr.msrb.gmra.mxu3 %vm549_vm9, %v786_v18 }
 0x386   :  { %775 = vmatmul.msk.bf16.gmra.mxu3 %vm549_vm9, %v787_v35 }
 0x3f9   :  { %v569_v38 = vpop.f32.mrf.mxu3 }
 0x3fa   :  { %v776_v39 = vmul.f32 -1.442695, %v569_v38 }
 0x3fc   :  { %819 = vpow2.f32 %v776_v39  ;;  %v208_v39 = vpop.permute.xlu2 %207 }
 0x401   :  { %v571_v40 = vpop.f32.mrf.mxu3 }
 0x402   :  { %v820_v41 = vpop.eup %819  ;;  %v777_v42 = vmul.f32 -1.442695, %v571_v40 }
 0x403   :  { %v591_v44 = vadd.f32 1.0, %v820_v41  ;;  %v138_v41 = vpop.f32.mrf.mxu0 }
 0x404   :  { %821 = vpow2.f32 %v777_v42  ;;  %v223_v40 = vpop.permute.xlu2 %222  ;;  %v218_v42 = vpop.permute.xlu1 %217 }
 0x405   :  { %823 = vrcp.f32 %v591_v44  ;;  %v606_v54 = vand.u32 2147483648, %v591_v44  ;;  %v604_v56 = vand.u32 2147483647, %v591_v44  ;;  %vm600_vm11 = vweird.f32 %v591_v44 }
 0x407   :  { %v607_v10 = vor.u32 1.1754944e-38, %v606_v54  ;;  %vm605_vm13 = vcmp.eq.f32.partialorder %v604_v56, 8.507059e+37  ;;  %v213_v54 = vpop.permute.xlu0 %212 }
 0x409   :  { %v574_v45 = vpop.f32.mrf.mxu3 }
 0x40a   :  { %v822_v46 = vpop.eup %821  ;;  %v778_v47 = vmul.f32 -1.442695, %v574_v45 }
 0x40b   :  { %v824_v48 = vpop.eup %823  ;;  %v592_v49 = vadd.f32 1.0, %v822_v46  ;;  %v140_v45 = vpop.f32.mrf.mxu0 }
 0x40c   :  { %825 = vpow2.f32 %v778_v47  ;;  %v596_v50 = vmul.f32 %v824_v48, %v591_v44  ;;  %vm601_vm10 = vweird.f32 %v824_v48  ;;  %v263_v44 = vpop.permute.xlu2 %262  ;;  %v259_v46 = vpop.permute.xlu1 %258 }
 0x40d   :  { %827 = vrcp.f32 %v592_v49  ;;  %vm602_vm12 = vmor %vm600_vm11, %vm601_vm10  ;;  %v621_v21 = vand.u32 2147483648, %v592_v49  ;;  %v619_v23 = vand.u32 2147483647, %v592_v49  ;;  %vm615_vm15 = vweird.f32 %v592_v49 }
 0x40e   :  { %v597_v51 = vsub.f32 1.0, %v596_v50 }
 0x40f   :  { %v622_v27 = vor.u32 1.1754944e-38, %v621_v21  ;;  %vm620_vm1 = vcmp.eq.f32.partialorder %v619_v23, 8.507059e+37 }
 0x410   :  { %v598_v55 = vmul.f32 %v824_v48, %v597_v51 }
 0x411   :  { %v576_v57 = vpop.f32.mrf.mxu3 }
 0x412   :  { %v826_v58 = vpop.eup %825  ;;  %v779_v59 = vmul.f32 -1.442695, %v576_v57  ;;  %v599_v5 = vadd.f32 %v824_v48, %v598_v55 }
 0x413   :  { %v828_v1 = vpop.eup %827  ;;  %v593_v3 = vadd.f32 1.0, %v826_v58 }
 0x414   :  { %829 = vpow2.f32 %v779_v59  ;;  %v603_v11 = vsel %vm602_vm12, %v824_v48, %v599_v5  ;;  %v611_v17 = vmul.f32 %v828_v1, %v592_v49  ;;  %vm616_vm14 = vweird.f32 %v828_v1  ;;  %v271_v47 = vpop.permute.xlu2 %270  ;;  %v167_v48 = vpop.f32.mrf.mxu1 }
 0x415   :  { %831 = vrcp.f32 %v593_v3  ;;  %v608_v19 = vsel %vm605_vm13, %v607_v10, %v603_v11  ;;  %vm617_vm0 = vmor %vm615_vm15, %vm616_vm14  ;;  %v636_v33 = vand.u32 2147483648, %v593_v3  ;;  %v634_v13 = vand.u32 2147483647, %v593_v3  ;;  %v143_v49 = vpop.f32.mrf.mxu0  ;;  %v267_v51 = vpop.permute.xlu1 %266 }
 0x416   :  { %680 = vperm.xlu1 %812, %v608_v19   ;;  %657 = vperm.xlu0 %810, %v608_v19   ;;  %v612_v20 = vsub.f32 1.0, %v611_v17  ;;  %vm630_vm3 = vweird.f32 %v593_v3  ;;  %v237_v50 = vmul.f32 %v218_v42, %v143_v49  ;;  %v233_v5 = vmul.f32 %v208_v39, %v138_v41 }
 0x417   :  { %v637_v14 = vor.u32 1.1754944e-38, %v636_v33  ;;  %vm635_vm5 = vcmp.eq.f32.partialorder %v634_v13, 8.507059e+37 }
 0x418   :  { %v613_v16 = vmul.f32 %v828_v1, %v612_v20  ;;  %v285_v55 = vadd.f32 %v267_v51, %v237_v50  ;;  %v281_v19 = vadd.f32 %v259_v46, %v233_v5 }
 0x41a   :  { %v830_v24 = vpop.eup %829  ;;  %v614_v6 = vadd.f32 %v828_v1, %v613_v16 }
 0x41b   :  { %v832_v25 = vpop.eup %831  ;;  %v594_v26 = vadd.f32 1.0, %v830_v24 }
 0x41c   :  { %v618_v22 = vsel %vm617_vm0, %v828_v1, %v614_v6  ;;  %v626_v28 = vmul.f32 %v832_v25, %v593_v3  ;;  %vm631_vm2 = vweird.f32 %v832_v25  ;;  %v234_v1 = vmul.f32 %v208_v39, %v167_v48 }
 0x41d   :  { %833 = vrcp.f32 %v594_v26  ;;  %v623_v29 = vsel %vm620_vm1, %v622_v27, %v618_v22  ;;  %vm632_vm4 = vmor %vm630_vm3, %vm631_vm2  ;;  %v649_v36 = vand.u32 2147483647, %v594_v26  ;;  %vm645_vm7 = vweird.f32 %v594_v26  ;;  %v145_v13 = vpop.f32.mrf.mxu0 }
 0x41e   :  { %814 = vset.pattern.permute.xlu1 %v838_v8  ;;  %v627_v32 = vsub.f32 1.0, %v626_v28  ;;  %v651_v8 = vand.u32 2147483648, %v594_v26  ;;  %v282_v20 = vadd.f32 %v259_v46, %v234_v1  ;;  %v235_v22 = vmul.f32 %v213_v54, %v140_v45 }
 0x41f   :  { %662 = vperm.xlu1 %814, %v623_v29   ;;  %vm650_vm9 = vcmp.eq.f32.partialorder %v649_v36, 8.507059e+37 }
 0x420   :  { %v628_v61 = vmul.f32 %v832_v25, %v627_v32  ;;  %v652_v31 = vor.u32 1.1754944e-38, %v651_v8 }
 0x422   :  { %v629_v30 = vadd.f32 %v832_v25, %v628_v61 }
 0x423   :  { %v834_v62 = vpop.eup %833 }
 0x424   :  { %v633_v15 = vsel %vm632_vm4, %v832_v25, %v629_v30  ;;  %v641_v18 = vmul.f32 %v834_v62, %v594_v26  ;;  %vm646_vm6 = vweird.f32 %v834_v62 }
 0x425   :  { %v638_v34 = vsel %vm635_vm5, %v637_v14, %v633_v15  ;;  %vm647_vm8 = vmor %vm645_vm7, %vm646_vm6 }
 0x426   :  { %667 = vperm.xlu2 %815, %v638_v34   ;;  %v642_v35 = vsub.f32 1.0, %v641_v18 }
 0x427   :  { %818 = vset.pattern.permute.xlu1 %v837_v7 }
 0x428   :  { %v643_v12 = vmul.f32 %v834_v62, %v642_v35 }
 0x42a   :  { %v644_v9 = vadd.f32 %v834_v62, %v643_v12 }
 0x42c   :  { %v648_v37 = vsel %vm647_vm8, %v834_v62, %v644_v9  ;;  %v239_v62 = vmul.f32 %v223_v40, %v145_v13 }
 0x42d   :  { %v653_v38 = vsel %vm650_vm9, %v652_v31, %v648_v37 }
 0x42e   :  { %816 = vset.pattern.permute.xlu2 %v837_v7  ;;  %692 = vperm.xlu1 %818, %v653_v38   ;;  %v287_v35 = vadd.f32 %v271_v47, %v239_v62 }
 0x42f   :  { %672 = vperm.xlu0 %810, %v653_v38   ;;  %684 = vperm.xlu2 %816, %v623_v29  }
 0x437   :  { %817 = vset.pattern.permute.xlu0 %v837_v7  ;;  %v169_v7 = vpop.f32.mrf.mxu1 }
 0x438   :  { %688 = vperm.xlu0 %817, %v638_v34   ;;  %v236_v59 = vmul.f32 %v213_v54, %v169_v7 }
 0x43a   :  { %v284_v10 = vadd.f32 %v263_v44, %v236_v59 }
 0x480   :  { %v668_v56 = vpop.permute.xlu2 %667 }
 0x481   :  { %v677_v57 = vmul.f32 %v668_v56, %v1135_v53 }
 0x483   :  { %v703_v58 = vadd.f32 %v677_v57, %v285_v55 }
 0x485   :  { %v711_v3 = vmax.f32 %v703_v58, 0.0 }
 0x487   :  { %719 = vst [vmem:[%s1230_s6 + $0x20] sm:$0xff] %v711_v3 }
 0x488   :  { %v681_v11 = vpop.permute.xlu1 %680  ;;  %v658_v17 = vpop.permute.xlu0 %657 }
 0x489   :  { %v695_v21 = vmul.f32 %v681_v11, %v1139_v60  ;;  %v675_v16 = vmul.f32 %v658_v17, %v1130_v43  ;;  %v685_v53 = vpop.permute.xlu2 %684  ;;  %v172_v60 = vpop.f32.mrf.mxu1 }
 0x48a   :  { %v696_v23 = vmul.f32 %v685_v53, %v1141_v63  ;;  %v283_v63 = vadd.f32 %v263_v44, %v235_v22  ;;  %v238_v31 = vmul.f32 %v218_v42, %v172_v60 }
 0x48b   :  { %v700_v24 = vadd.f32 %v695_v21, %v282_v20  ;;  %v699_v6 = vadd.f32 %v675_v16, %v281_v19 }
 0x48c   :  { %v702_v25 = vadd.f32 %v696_v23, %v284_v10  ;;  %v286_v38 = vadd.f32 %v267_v51, %v238_v31 }
 0x48d   :  { %v708_v26 = vmax.f32 %v700_v24, 0.0  ;;  %v707_v27 = vmax.f32 %v699_v6, 0.0 }
 0x48e   :  { %v710_v28 = vmax.f32 %v702_v25, 0.0 }
 0x48f   :  { %716 = vst [vmem:[%s1230_s6 + $0x8] sm:$0xff] %v708_v26 }
 0x490   :  { %715 = vst [vmem:[%s1230_s6] sm:$0xff] %v707_v27 }
 0x491   :  { %718 = vst [vmem:[%s1230_s6 + $0x18] sm:$0xff] %v710_v28  ;;  %v663_v43 = vpop.permute.xlu1 %662  ;;  %v174_v61 = vpop.f32.mrf.mxu1 }
 0x492   :  { %v676_v29 = vmul.f32 %v663_v43, %v1151_v4  ;;  %v240_v30 = vmul.f32 %v223_v40, %v174_v61 }
 0x494   :  { %v701_v32 = vadd.f32 %v676_v29, %v283_v63  ;;  %v288_v15 = vadd.f32 %v271_v47, %v240_v30 }
 0x496   :  { %v709_v33 = vmax.f32 %v701_v32, 0.0 }
 0x498   :  { %717 = vst [vmem:[%s1230_s6 + $0x10] sm:$0xff] %v709_v33 }
 0x4a0   :  { %v693_v14 = vpop.permute.xlu1 %692 }
 0x4a1   :  { %v698_v18 = vmul.f32 %v693_v14, %v1148_v2  ;;  %v673_v34 = vpop.permute.xlu0 %672 }
 0x4a2   :  { %v678_v8 = vmul.f32 %v673_v34, %v1143_v0 }
 0x4a3   :  { %v706_v12 = vadd.f32 %v698_v18, %v288_v15 }
 0x4a4   :  { %v705_v4 = vadd.f32 %v678_v8, %v287_v35 }
 0x4a5   :  { %v714_v36 = vmax.f32 %v706_v12, 0.0 }
 0x4a6   :  { %v713_v9 = vmax.f32 %v705_v4, 0.0 }
 0x4a7   :  { %722 = vst [vmem:[%s1230_s6 + $0x38] sm:$0xff] %v714_v36 }
 0x4a8   :  { %721 = vst [vmem:[%s1230_s6 + $0x30] sm:$0xff] %v713_v9 }
 0x4aa   :  { %v689_v37 = vpop.permute.xlu0 %688 }
 0x4ab   :  { %v697_v2 = vmul.f32 %v689_v37, %v1133_v52 }
 0x4ad   :  { %v704_v39 = vadd.f32 %v697_v2, %v286_v38 }
 0x4af   :  { %v712_v40 = vmax.f32 %v704_v39, 0.0 }
 0x4b1   :  { %720 = vst [vmem:[%s1230_s6 + $0x28] sm:$0xff] %v712_v40 }

</bundles_post_ra>
